<compile_context>
chip_gen: v5e
topology: v5e:2x2
jax: 0.10.0
libtpu: 0.0.40
codegen_flags: <defaults>
</compile_context>

<pallas_src>
import functools
import math

import jax
import jax.numpy as jnp
from jax.experimental import pallas as pl
from jax.experimental.pallas import tpu as pltpu


# ----------------------------------------------------------------------------- kernel


def _imha_kernel(qs_ref, ks_ref, vs_ref, wh_ref, out_ref, attn_ref,
                 *, n_head: int, d_k: int, compute_dtype, approx_recip: bool):
    bt, tq, _ = qs_ref.shape          # batch-tile, query-tile, H*d_k
    s = ks_ref.shape[1]               # full key/value sequence length
    cd = compute_dtype
    scale = 1.0 / math.sqrt(float(d_k))

    qs_all = qs_ref[...].astype(cd)   # (bt, tq, H*d_k)
    ks_all = ks_ref[...].astype(cd)   # (bt, s,  H*d_k)
    vs = vs_ref[...].astype(cd)       # (bt, s,  d_k)

    attn_sum = jnp.zeros((bt, tq, s), jnp.float32)
    for h in range(n_head):           # n_head is small & static -> unrolled
        qs = qs_all[:, :, h * d_k:(h + 1) * d_k]
        ks = ks_all[:, :, h * d_k:(h + 1) * d_k]
        scores = jnp.einsum("bqe,bke->bqk", qs, ks,
                            preferred_element_type=jnp.float32) * scale
        # TODO(synk): mask / dropout paths are identity here (mask=None, p=0.0).
        scores = scores - jnp.max(scores, axis=-1, keepdims=True)
        e = jnp.exp(scores)
        inv = pl.reciprocal(jnp.sum(e, axis=-1, keepdims=True),
                            approx=approx_recip)
        attn = e * inv                                     # (bt, tq, s), f32
        # Lane-dense store: the attn output block is (bt, tq, n_head*s); each
        # head writes a contiguous lane slab (no sublane-strided masked stores).
        attn_ref[:, :, h * s:(h + 1) * s] = attn.astype(attn_ref.dtype)
        attn_sum = attn_sum + attn

    # Mean over heads commutes with the shared V projection and w_h (linearity):
    #   mean_h(attn_h @ vs) @ w_h == (mean_h attn_h) @ vs @ w_h
    attn_mean = attn_sum * (1.0 / float(n_head))
    head = jnp.einsum("bqk,bke->bqe", attn_mean.astype(cd), vs,
                      preferred_element_type=jnp.float32)  # (bt, tq, d_k)
    out = jnp.einsum("bqe,ed->bqd", head.astype(cd), wh_ref[...].astype(cd),
                     preferred_element_type=jnp.float32)
    out_ref[...] = out.astype(out_ref.dtype)


# ----------------------------------------------------------------------------- sizing


def _round_up(x, m):
    return ((x + m - 1) // m) * m


def _vmem_capacity_bytes():
    try:
        info = pltpu.get_tpu_info()
        cap = getattr(info, "vmem_capacity_bytes", None)
        if cap:
            return int(cap)
    except Exception:
        pass
    return 64 << 20   # conservative fallback: v7x per-TensorCore VMEM


def _vmem_block_bytes(bt, tq, s, d_model, n_head, d_k, in_isz, attn_isz):
    dk_all = n_head * d_k
    # Pipelined I/O blocks (double-buffered by the BlockSpec pipeline), with
    # crude (8, 128) layout padding on the minor dims.
    qs_blk = bt * _round_up(tq, 8) * _round_up(dk_all, 128) * in_isz
    ks_blk = bt * _round_up(s, 8) * _round_up(dk_all, 128) * in_isz
    vs_blk = bt * _round_up(s, 8) * _round_up(d_k, 128) * in_isz
    wh_blk = _round_up(d_k, 8) * _round_up(d_model, 128) * in_isz
    out_blk = bt * _round_up(tq, 8) * _round_up(d_model, 128) * in_isz
    attn_blk = bt * _round_up(tq, 8) * _round_up(n_head * s, 128) * attn_isz
    pipelined = 2 * (qs_blk + ks_blk + vs_blk + wh_blk + out_blk + attn_blk)
    # In-kernel intermediates (f32): scores / exp / attn live per head plus the
    # running attn_sum, the head tile and the cast copies of ks_all / vs.
    interm = (4 * bt * _round_up(tq, 8) * _round_up(s, 128)
              + bt * _round_up(tq, 8) * _round_up(d_k, 128)
              + bt * _round_up(s, 8) * (_round_up(dk_all, 128) + _round_up(d_k, 128))
              ) * 4
    return pipelined + interm


def _choose_tiles(B, S, d_model, n_head, d_k, in_dtype, attn_dtype, vmem_budget):
    in_isz = jnp.dtype(in_dtype).itemsize
    attn_isz = jnp.dtype(attn_dtype).itemsize

    def fits(bt, tq):
        return _vmem_block_bytes(bt, tq, S, d_model, n_head, d_k,
                                 in_isz, attn_isz) <= vmem_budget

    # Valid query tiles: divisors of S that respect the (8, 128) layout rule
    # (multiples of 8), plus the full S.  Pick the largest one that fits.
    cands = sorted({d for d in range(8, S + 1, 8) if S % d == 0} | {S},
                   reverse=True)
    tq = cands[-1]
    for cand in cands:
        if fits(1, cand):
            tq = cand
            break
    # TODO(synk): for S too long for full-key VMEM residency even at the
    # smallest tq, a key-axis-tiled two-pass softmax would be required.

    # Tiny-shape regime: fold batch elements into one block to fill sublanes
    # and amortise per-grid-step overhead; keep >=2 grid steps for v7x's 2 TCs.
    bt = 1
    if tq == S and S <= 64 and B > 1:
        cap = max(1, min(B // 2, 1024 // max(S, 1)))
        for cand in range(cap, 0, -1):
            if B % cand == 0 and fits(cand, tq):
                bt = cand
                break

    # If the grid degenerated to a single step (B == 1, tq == S), split the
    # query axis so a second TensorCore (v7x) has work.
    if (B // bt) * (S // tq) < 2:
        for cand in cands:
            if cand < S:
                tq = cand
                break
    return bt, tq


# ----------------------------------------------------------------------------- wrapper


def interpretable_mha(q, k, v, params, *, n_head: int,
                      attn_dtype=None, compute_dtype=None):
    """Returns (outputs [B,S,d_model], attention [B,Sq,H,Sk])."""
    B, S, d_model = q.shape
    d_k = d_model // n_head
    attn_dtype = jnp.dtype(attn_dtype) if attn_dtype is not None else jnp.dtype(q.dtype)
    compute_dtype = (jnp.dtype(compute_dtype) if compute_dtype is not None
                     else jnp.dtype(q.dtype))

    # Fuse the per-head Q/K weights: (H, d_model, d_k) -> (d_model, H*d_k).
    wq_all = jnp.transpose(params["wq"], (1, 0, 2)).reshape(d_model, n_head * d_k)
    wk_all = jnp.transpose(params["wk"], (1, 0, 2)).reshape(d_model, n_head * d_k)
    bq_all = params["bq"].reshape(n_head * d_k)
    bk_all = params["bk"].reshape(n_head * d_k)

    # Q/K/V projections hoisted into XLA (perf review): K/V blocks are reused
    # by every query tile, so projecting once removes redundant per-tile MXU
    # work and shrinks the V HBM read to d_k-wide.
    qs_all = jnp.einsum("bsd,de->bse", q, wq_all) + bq_all
    ks_all = jnp.einsum("bsd,de->bse", k, wk_all) + bk_all
    vs = jnp.einsum("bsd,de->bse", v, params["wv"]) + params["bv"]

    # Feeding the kernel in compute_dtype (bf16 fast path) halves the Q/K/V
    # HBM reads and their resident VMEM blocks.
    feed_dtype = compute_dtype
    qs_all = qs_all.astype(feed_dtype)
    ks_all = ks_all.astype(feed_dtype)
    vs = vs.astype(feed_dtype)
    wh = params["wh"].astype(feed_dtype)

    vmem_cap = _vmem_capacity_bytes()
    vmem_budget = (vmem_cap * 5) // 8         # ~80 MiB on v5e/v6e, ~40 MiB on v7x
    bt, tq = _choose_tiles(B, S, d_model, n_head, d_k,
                           feed_dtype, attn_dtype, vmem_budget)
    grid = (B // bt, S // tq)

    est = _vmem_block_bytes(bt, tq, S, d_model, n_head, d_k,
                            jnp.dtype(feed_dtype).itemsize, attn_dtype.itemsize)
    upper = max(32 << 20, vmem_cap - (8 << 20))   # never exceed physical VMEM
    vmem_limit = int(min(max(est + (16 << 20), 32 << 20), upper))

    kernel = functools.partial(
        _imha_kernel, n_head=n_head, d_k=d_k, compute_dtype=compute_dtype,
        # approx reciprocal (EUP vrcp) only on the reduced-precision path so the
        # default f32 path keeps 1e-4-level agreement with the reference.
        approx_recip=(compute_dtype != jnp.dtype("float32")))

    out, attn_flat = pl.pallas_call(
        kernel,
        out_shape=(
            jax.ShapeDtypeStruct((B, S, d_model), q.dtype),
            jax.ShapeDtypeStruct((B, S, n_head * S), attn_dtype),   # lane-dense
        ),
        grid_spec=pltpu.PrefetchScalarGridSpec(
            num_scalar_prefetch=0,
            grid=grid,
            in_specs=[
                pl.BlockSpec((bt, tq, n_head * d_k), lambda b, i: (b, i, 0)),  # qs
                pl.BlockSpec((bt, S, n_head * d_k), lambda b, i: (b, 0, 0)),   # ks (full S)
                pl.BlockSpec((bt, S, d_k), lambda b, i: (b, 0, 0)),            # vs (full S)
                pl.BlockSpec((d_k, d_model), lambda b, i: (0, 0)),             # wh
            ],
            out_specs=[
                pl.BlockSpec((bt, tq, d_model), lambda b, i: (b, i, 0)),
                pl.BlockSpec((bt, tq, n_head * S), lambda b, i: (b, i, 0)),
            ],
        ),
        compiler_params=pltpu.CompilerParams(
            dimension_semantics=("parallel", "parallel"),
            vmem_limit_bytes=vmem_limit),
    )(qs_all, ks_all, vs, wh)

    # Free row-major reshape to the PyTorch [B, Sq, H, Sk] layout.
    attn = attn_flat.reshape(B, S, n_head, S)
    return out, attn


# ----------------------------------------------------------------------------- reference / test


def _xavier_uniform(key, fan_in, fan_out, shape):
    bound = math.sqrt(6.0 / (fan_in + fan_out))
    return jax.random.uniform(key, shape, jnp.float32, -bound, bound)


def init_params(key, n_head, d_model):
    d_k = d_model // n_head
    ks = jax.random.split(key, 2 * n_head + 2)
    # nn.Linear weight is (out, in); we store the transpose (in, out). Xavier
    # bounds depend only on fan_in+fan_out so the transpose uses the same bound.
    wq = jnp.stack([_xavier_uniform(ks[i], d_model, d_k, (d_model, d_k))
                    for i in range(n_head)], axis=0)
    wk = jnp.stack([_xavier_uniform(ks[n_head + i], d_model, d_k, (d_model, d_k))
                    for i in range(n_head)], axis=0)
    wv = _xavier_uniform(ks[2 * n_head], d_model, d_k, (d_model, d_k))
    wh = _xavier_uniform(ks[2 * n_head + 1], d_k, d_model, (d_k, d_model))
    return {
        "wq": wq, "bq": jnp.zeros((n_head, d_k), jnp.float32),
        "wk": wk, "bk": jnp.zeros((n_head, d_k), jnp.float32),
        "wv": wv, "bv": jnp.zeros((1, d_k), jnp.float32),
        "wh": wh,
    }


def reference_mha(q, k, v, params, *, n_head: int):
    d_k = q.shape[-1] // n_head
    vs = jnp.einsum("bsd,de->bse", v, params["wv"]) + params["bv"]
    heads, attns = [], []
    for h in range(n_head):
        qs = jnp.einsum("bsd,de->bse", q, params["wq"][h]) + params["bq"][h]
        ks = jnp.einsum("bsd,de->bse", k, params["wk"][h]) + params["bk"][h]
        sc = jnp.einsum("bqe,bke->bqk", qs, ks) / math.sqrt(d_k)
        attn = jax.nn.softmax(sc, axis=-1)
        heads.append(jnp.einsum("bqk,bke->bqe", attn, vs))
        attns.append(attn)
    head = jnp.stack(heads, axis=2)
    attn = jnp.stack(attns, axis=2)
    out = jnp.einsum("bse,ed->bsd", jnp.mean(head, axis=2), params["wh"])
    return out, attn


if __name__ == "__main__":
    B, S, d_model, n_head = 2, 8, 32, 4

    key = jax.random.PRNGKey(0)
    kq, kk, kv, kp = jax.random.split(key, 4)
    q = jax.random.normal(kq, (B, S, d_model), jnp.float32)
    k = jax.random.normal(kk, (B, S, d_model), jnp.float32)
    v = jax.random.normal(kv, (B, S, d_model), jnp.float32)
    params = init_params(kp, n_head, d_model)

    out_exp, attn_exp = reference_mha(q, k, v, params, n_head=n_head)

    # Default path: f32 numerics matching the PyTorch module.
    out, attn = interpretable_mha(q, k, v, params, n_head=n_head)
    out, attn = jax.block_until_ready((out, attn))
    assert out.shape == (B, S, d_model) and attn.shape == (B, S, n_head, S)
    assert jnp.allclose(out, out_exp, atol=1e-4, rtol=1e-4)
    assert jnp.allclose(attn, attn_exp, atol=1e-4, rtol=1e-4)

    # Recommended fast path (perf review): bf16 MXU operands + bf16 attention
    # writeback; accumulation stays f32, so the looser tolerance only reflects
    # bf16 operand/storage rounding.
    out_bf, attn_bf = interpretable_mha(q, k, v, params, n_head=n_head,
                                        attn_dtype=jnp.bfloat16,
                                        compute_dtype=jnp.bfloat16)
    out_bf, attn_bf = jax.block_until_ready((out_bf, attn_bf))
    assert jnp.allclose(out_bf.astype(jnp.float32), out_exp, atol=8e-2, rtol=8e-2)
    assert jnp.allclose(attn_bf.astype(jnp.float32), attn_exp, atol=3e-2, rtol=3e-2)

    print("KERNEL_OK")
</pallas_src>

<mosaic_0001>
module attributes {stable_mosaic.version = 11 : i64} {
  func.func @_imha_kernel(%arg0: i32, %arg1: i32, %arg2: memref<1x8x32xf32, #tpu.memory_space<vmem>>, %arg3: memref<1x8x32xf32, #tpu.memory_space<vmem>>, %arg4: memref<1x8x8xf32, #tpu.memory_space<vmem>>, %arg5: memref<8x32xf32, #tpu.memory_space<vmem>>, %arg6: memref<1x8x32xf32, #tpu.memory_space<vmem>>, %arg7: memref<1x8x32xf32, #tpu.memory_space<vmem>>) attributes {dimension_semantics = [#tpu.dimension_semantics<parallel>, #tpu.dimension_semantics<parallel>], iteration_bounds = array<i64: 2, 1>, scalar_prefetch = 0 : i64, scratch_operands = 0 : i64, tpu.core_type = #tpu.core_type<tc>, window_params = [{transform_indices = @transform_0, window_bounds = array<i64: 1, 8, 32>}, {transform_indices = @transform_1, window_bounds = array<i64: 1, 8, 32>}, {transform_indices = @transform_2, window_bounds = array<i64: 1, 8, 8>}, {pipeline_mode = #tpu.pipeline_mode<synchronous>, transform_indices = @transform_3, window_bounds = array<i64: 8, 32>}, {transform_indices = @transform_4, window_bounds = array<i64: 1, 8, 32>}, {transform_indices = @transform_5, window_bounds = array<i64: 1, 8, 32>}]} {
    %c0 = arith.constant 0 : index
    %c0_0 = arith.constant 0 : index
    %c0_1 = arith.constant 0 : index
    %0 = vector.load %arg2[%c0, %c0_0, %c0_1] : memref<1x8x32xf32, #tpu.memory_space<vmem>>, vector<1x8x32xf32>
    %c0_2 = arith.constant 0 : index
    %c0_3 = arith.constant 0 : index
    %c0_4 = arith.constant 0 : index
    %1 = vector.load %arg3[%c0_2, %c0_3, %c0_4] : memref<1x8x32xf32, #tpu.memory_space<vmem>>, vector<1x8x32xf32>
    %c0_5 = arith.constant 0 : index
    %c0_6 = arith.constant 0 : index
    %c0_7 = arith.constant 0 : index
    %2 = vector.load %arg4[%c0_5, %c0_6, %c0_7] : memref<1x8x8xf32, #tpu.memory_space<vmem>>, vector<1x8x8xf32>
    %cst = arith.constant 0.000000e+00 : f32
    %3 = vector.broadcast %cst : f32 to vector<1x8x8xf32>
    %4 = vector.extract_strided_slice %0 {offsets = [0, 0, 0], sizes = [1, 8, 8], strides = [1, 1, 1]} : vector<1x8x32xf32> to vector<1x8x8xf32>
    %5 = vector.extract_strided_slice %1 {offsets = [0, 0, 0], sizes = [1, 8, 8], strides = [1, 1, 1]} : vector<1x8x32xf32> to vector<1x8x8xf32>
    "tpu.trace_start"() <{level = 10 : i32, message = "bqe,bke->bqk"}> : () -> ()
    %cst_8 = arith.constant dense<0.000000e+00> : vector<1x8x8xf32>
    %6 = tpu.matmul %4, %5, %cst_8 {dimension_numbers = #tpu.dot_dimension_numbers<[2], [2], [1], [1], [0, 0, 0, 1, 1, 1], [0], [0]>} : vector<1x8x8xf32>, vector<1x8x8xf32>, vector<1x8x8xf32> -> vector<1x8x8xf32>
    "tpu.trace_stop"() : () -> ()
    %cst_9 = arith.constant 0.353553385 : f32
    %7 = vector.broadcast %cst_9 : f32 to vector<1x8x8xf32>
    %8 = arith.mulf %6, %7 : vector<1x8x8xf32>
    %cst_10 = arith.constant dense<0xFF800000> : vector<1x8xf32>
    %9 = vector.multi_reduction <maximumf>, %8, %cst_10 [2] : vector<1x8x8xf32> to vector<1x8xf32>
    %10 = vector.shape_cast %9 : vector<1x8xf32> to vector<1x8x1xf32>
    %11 = vector.broadcast %10 : vector<1x8x1xf32> to vector<1x8x8xf32>
    %12 = arith.subf %8, %11 : vector<1x8x8xf32>
    %13 = math.exp %12 : vector<1x8x8xf32>
    %cst_11 = arith.constant dense<0.000000e+00> : vector<1x8xf32>
    %14 = vector.multi_reduction <add>, %13, %cst_11 [2] : vector<1x8x8xf32> to vector<1x8xf32>
    %15 = vector.shape_cast %14 : vector<1x8xf32> to vector<1x8x1xf32>
    %16 = tpu.reciprocal %15 : vector<1x8x1xf32> -> vector<1x8x1xf32>
    %17 = vector.broadcast %16 : vector<1x8x1xf32> to vector<1x8x8xf32>
    %18 = arith.mulf %13, %17 : vector<1x8x8xf32>
    %c0_12 = arith.constant 0 : index
    %c0_13 = arith.constant 0 : index
    %c0_14 = arith.constant 0 : index
    %19 = vector.load %arg7[%c0_12, %c0_13, %c0_14] : memref<1x8x32xf32, #tpu.memory_space<vmem>>, vector<1x8x8xf32>
    tpu.vector_store %arg7[%c0_12, %c0_13, %c0_14], %18 {strides = array<i32>} : memref<1x8x32xf32, #tpu.memory_space<vmem>>, vector<1x8x8xf32>,
    %20 = arith.addf %3, %18 : vector<1x8x8xf32>
    %21 = vector.extract_strided_slice %0 {offsets = [0, 0, 8], sizes = [1, 8, 8], strides = [1, 1, 1]} : vector<1x8x32xf32> to vector<1x8x8xf32>
    %22 = vector.extract_strided_slice %1 {offsets = [0, 0, 8], sizes = [1, 8, 8], strides = [1, 1, 1]} : vector<1x8x32xf32> to vector<1x8x8xf32>
    "tpu.trace_start"() <{level = 10 : i32, message = "bqe,bke->bqk"}> : () -> ()
    %cst_15 = arith.constant dense<0.000000e+00> : vector<1x8x8xf32>
    %23 = tpu.matmul %21, %22, %cst_15 {dimension_numbers = #tpu.dot_dimension_numbers<[2], [2], [1], [1], [0, 0, 0, 1, 1, 1], [0], [0]>} : vector<1x8x8xf32>, vector<1x8x8xf32>, vector<1x8x8xf32> -> vector<1x8x8xf32>
    "tpu.trace_stop"() : () -> ()
    %cst_16 = arith.constant 0.353553385 : f32
    %24 = vector.broadcast %cst_16 : f32 to vector<1x8x8xf32>
    %25 = arith.mulf %23, %24 : vector<1x8x8xf32>
    %cst_17 = arith.constant dense<0xFF800000> : vector<1x8xf32>
    %26 = vector.multi_reduction <maximumf>, %25, %cst_17 [2] : vector<1x8x8xf32> to vector<1x8xf32>
    %27 = vector.shape_cast %26 : vector<1x8xf32> to vector<1x8x1xf32>
    %28 = vector.broadcast %27 : vector<1x8x1xf32> to vector<1x8x8xf32>
    %29 = arith.subf %25, %28 : vector<1x8x8xf32>
    %30 = math.exp %29 : vector<1x8x8xf32>
    %cst_18 = arith.constant dense<0.000000e+00> : vector<1x8xf32>
    %31 = vector.multi_reduction <add>, %30, %cst_18 [2] : vector<1x8x8xf32> to vector<1x8xf32>
    %32 = vector.shape_cast %31 : vector<1x8xf32> to vector<1x8x1xf32>
    %33 = tpu.reciprocal %32 : vector<1x8x1xf32> -> vector<1x8x1xf32>
    %34 = vector.broadcast %33 : vector<1x8x1xf32> to vector<1x8x8xf32>
    %35 = arith.mulf %30, %34 : vector<1x8x8xf32>
    %c0_19 = arith.constant 0 : index
    %c0_20 = arith.constant 0 : index
    %c8 = arith.constant 8 : index
    %36 = vector.load %arg7[%c0_19, %c0_20, %c8] : memref<1x8x32xf32, #tpu.memory_space<vmem>>, vector<1x8x8xf32>
    tpu.vector_store %arg7[%c0_19, %c0_20, %c8], %35 {strides = array<i32>} : memref<1x8x32xf32, #tpu.memory_space<vmem>>, vector<1x8x8xf32>,
    %37 = arith.addf %20, %35 : vector<1x8x8xf32>
    %38 = vector.extract_strided_slice %0 {offsets = [0, 0, 16], sizes = [1, 8, 8], strides = [1, 1, 1]} : vector<1x8x32xf32> to vector<1x8x8xf32>
    %39 = vector.extract_strided_slice %1 {offsets = [0, 0, 16], sizes = [1, 8, 8], strides = [1, 1, 1]} : vector<1x8x32xf32> to vector<1x8x8xf32>
    "tpu.trace_start"() <{level = 10 : i32, message = "bqe,bke->bqk"}> : () -> ()
    %cst_21 = arith.constant dense<0.000000e+00> : vector<1x8x8xf32>
    %40 = tpu.matmul %38, %39, %cst_21 {dimension_numbers = #tpu.dot_dimension_numbers<[2], [2], [1], [1], [0, 0, 0, 1, 1, 1], [0], [0]>} : vector<1x8x8xf32>, vector<1x8x8xf32>, vector<1x8x8xf32> -> vector<1x8x8xf32>
    "tpu.trace_stop"() : () -> ()
    %cst_22 = arith.constant 0.353553385 : f32
    %41 = vector.broadcast %cst_22 : f32 to vector<1x8x8xf32>
    %42 = arith.mulf %40, %41 : vector<1x8x8xf32>
    %cst_23 = arith.constant dense<0xFF800000> : vector<1x8xf32>
    %43 = vector.multi_reduction <maximumf>, %42, %cst_23 [2] : vector<1x8x8xf32> to vector<1x8xf32>
    %44 = vector.shape_cast %43 : vector<1x8xf32> to vector<1x8x1xf32>
    %45 = vector.broadcast %44 : vector<1x8x1xf32> to vector<1x8x8xf32>
    %46 = arith.subf %42, %45 : vector<1x8x8xf32>
    %47 = math.exp %46 : vector<1x8x8xf32>
    %cst_24 = arith.constant dense<0.000000e+00> : vector<1x8xf32>
    %48 = vector.multi_reduction <add>, %47, %cst_24 [2] : vector<1x8x8xf32> to vector<1x8xf32>
    %49 = vector.shape_cast %48 : vector<1x8xf32> to vector<1x8x1xf32>
    %50 = tpu.reciprocal %49 : vector<1x8x1xf32> -> vector<1x8x1xf32>
    %51 = vector.broadcast %50 : vector<1x8x1xf32> to vector<1x8x8xf32>
    %52 = arith.mulf %47, %51 : vector<1x8x8xf32>
    %c0_25 = arith.constant 0 : index
    %c0_26 = arith.constant 0 : index
    %c16 = arith.constant 16 : index
    %53 = vector.load %arg7[%c0_25, %c0_26, %c16] : memref<1x8x32xf32, #tpu.memory_space<vmem>>, vector<1x8x8xf32>
    tpu.vector_store %arg7[%c0_25, %c0_26, %c16], %52 {strides = array<i32>} : memref<1x8x32xf32, #tpu.memory_space<vmem>>, vector<1x8x8xf32>,
    %54 = arith.addf %37, %52 : vector<1x8x8xf32>
    %55 = vector.extract_strided_slice %0 {offsets = [0, 0, 24], sizes = [1, 8, 8], strides = [1, 1, 1]} : vector<1x8x32xf32> to vector<1x8x8xf32>
    %56 = vector.extract_strided_slice %1 {offsets = [0, 0, 24], sizes = [1, 8, 8], strides = [1, 1, 1]} : vector<1x8x32xf32> to vector<1x8x8xf32>
    "tpu.trace_start"() <{level = 10 : i32, message = "bqe,bke->bqk"}> : () -> ()
    %cst_27 = arith.constant dense<0.000000e+00> : vector<1x8x8xf32>
    %57 = tpu.matmul %55, %56, %cst_27 {dimension_numbers = #tpu.dot_dimension_numbers<[2], [2], [1], [1], [0, 0, 0, 1, 1, 1], [0], [0]>} : vector<1x8x8xf32>, vector<1x8x8xf32>, vector<1x8x8xf32> -> vector<1x8x8xf32>
    "tpu.trace_stop"() : () -> ()
    %cst_28 = arith.constant 0.353553385 : f32
    %58 = vector.broadcast %cst_28 : f32 to vector<1x8x8xf32>
    %59 = arith.mulf %57, %58 : vector<1x8x8xf32>
    %cst_29 = arith.constant dense<0xFF800000> : vector<1x8xf32>
    %60 = vector.multi_reduction <maximumf>, %59, %cst_29 [2] : vector<1x8x8xf32> to vector<1x8xf32>
    %61 = vector.shape_cast %60 : vector<1x8xf32> to vector<1x8x1xf32>
    %62 = vector.broadcast %61 : vector<1x8x1xf32> to vector<1x8x8xf32>
    %63 = arith.subf %59, %62 : vector<1x8x8xf32>
    %64 = math.exp %63 : vector<1x8x8xf32>
    %cst_30 = arith.constant dense<0.000000e+00> : vector<1x8xf32>
    %65 = vector.multi_reduction <add>, %64, %cst_30 [2] : vector<1x8x8xf32> to vector<1x8xf32>
    %66 = vector.shape_cast %65 : vector<1x8xf32> to vector<1x8x1xf32>
    %67 = tpu.reciprocal %66 : vector<1x8x1xf32> -> vector<1x8x1xf32>
    %68 = vector.broadcast %67 : vector<1x8x1xf32> to vector<1x8x8xf32>
    %69 = arith.mulf %64, %68 : vector<1x8x8xf32>
    %c0_31 = arith.constant 0 : index
    %c0_32 = arith.constant 0 : index
    %c24 = arith.constant 24 : index
    %70 = vector.load %arg7[%c0_31, %c0_32, %c24] : memref<1x8x32xf32, #tpu.memory_space<vmem>>, vector<1x8x8xf32>
    tpu.vector_store %arg7[%c0_31, %c0_32, %c24], %69 {strides = array<i32>} : memref<1x8x32xf32, #tpu.memory_space<vmem>>, vector<1x8x8xf32>,
    %71 = arith.addf %54, %69 : vector<1x8x8xf32>
    %cst_33 = arith.constant 2.500000e-01 : f32
    %72 = vector.broadcast %cst_33 : f32 to vector<1x8x8xf32>
    %73 = arith.mulf %71, %72 : vector<1x8x8xf32>
    "tpu.trace_start"() <{level = 10 : i32, message = "bqk,bke->bqe"}> : () -> ()
    %cst_34 = arith.constant dense<0.000000e+00> : vector<1x8x8xf32>
    %74 = tpu.matmul %73, %2, %cst_34 {dimension_numbers = #tpu.dot_dimension_numbers<[2], [1], [1], [2], [0, 0, 0, 1, 1, 2], [0], [0]>} : vector<1x8x8xf32>, vector<1x8x8xf32>, vector<1x8x8xf32> -> vector<1x8x8xf32>
    "tpu.trace_stop"() : () -> ()
    %c0_35 = arith.constant 0 : index
    %c0_36 = arith.constant 0 : index
    %75 = vector.load %arg5[%c0_35, %c0_36] : memref<8x32xf32, #tpu.memory_space<vmem>>, vector<8x32xf32>
    "tpu.trace_start"() <{level = 10 : i32, message = "bqe,ed->bqd"}> : () -> ()
    %cst_37 = arith.constant dense<0.000000e+00> : vector<1x8x32xf32>
    %76 = tpu.matmul %74, %75, %cst_37 {dimension_numbers = #tpu.dot_dimension_numbers<[2], [0], [0, 1], [1], [0, 0, 0, 1, 1, 1], [], []>} : vector<1x8x8xf32>, vector<8x32xf32>, vector<1x8x32xf32> -> vector<1x8x32xf32>
    "tpu.trace_stop"() : () -> ()
    %c0_38 = arith.constant 0 : index
    %c0_39 = arith.constant 0 : index
    %c0_40 = arith.constant 0 : index
    %77 = vector.load %arg6[%c0_38, %c0_39, %c0_40] : memref<1x8x32xf32, #tpu.memory_space<vmem>>, vector<1x8x32xf32>
    tpu.vector_store %arg6[%c0_38, %c0_39, %c0_40], %76 {strides = array<i32>} : memref<1x8x32xf32, #tpu.memory_space<vmem>>, vector<1x8x32xf32>,
    return
  }
  func.func @transform_0(%arg0: i32, %arg1: i32) -> (i32, i32, i32) {
    %c0_i32 = arith.constant 0 : i32
    %c0_i32_0 = arith.constant 0 : i32
    return %arg0, %arg1, %c0_i32 : i32, i32, i32
  }
  func.func @transform_1(%arg0: i32, %arg1: i32) -> (i32, i32, i32) {
    %c0_i32 = arith.constant 0 : i32
    %c0_i32_0 = arith.constant 0 : i32
    %c0_i32_1 = arith.constant 0 : i32
    return %arg0, %c0_i32, %c0_i32_0 : i32, i32, i32
  }
  func.func @transform_2(%arg0: i32, %arg1: i32) -> (i32, i32, i32) {
    %c0_i32 = arith.constant 0 : i32
    %c0_i32_0 = arith.constant 0 : i32
    %c0_i32_1 = arith.constant 0 : i32
    return %arg0, %c0_i32, %c0_i32_0 : i32, i32, i32
  }
  func.func @transform_3(%arg0: i32, %arg1: i32) -> (i32, i32) {
    %c0_i32 = arith.constant 0 : i32
    %c0_i32_0 = arith.constant 0 : i32
    %c0_i32_1 = arith.constant 0 : i32
    return %c0_i32, %c0_i32_0 : i32, i32
  }
  func.func @transform_4(%arg0: i32, %arg1: i32) -> (i32, i32, i32) {
    %c0_i32 = arith.constant 0 : i32
    %c0_i32_0 = arith.constant 0 : i32
    return %arg0, %arg1, %c0_i32 : i32, i32, i32
  }
  func.func @transform_5(%arg0: i32, %arg1: i32) -> (i32, i32, i32) {
    %c0_i32 = arith.constant 0 : i32
    %c0_i32_0 = arith.constant 0 : i32
    return %arg0, %arg1, %c0_i32 : i32, i32, i32
  }
}

</mosaic_0001>

<bundles_post_ra>
// kernel: tpu_custom_call.1
= control target key start
LH: loop header
LB: loop body
LE: loop exit
PB: predicated region body
PF: predicated region fallthrough
CT: control target
= control target key end

     0   :  { %s1522_s0 = inlined_call_operand.hbm [shape: f32[2,8,32], index: 0, kind: input, shape index: {}]   ;;  %s1523_s1 = inlined_call_operand.hbm [shape: f32[2,8,32], index: 1, kind: input, shape index: {}]   ;;  %s1524_s2 = inlined_call_operand.hbm [shape: f32[2,8,8], index: 2, kind: input, shape index: {}]   ;;  %s1525_s3 = inlined_call_operand.hbm [shape: f32[8,32], index: 3, kind: input, shape index: {}]   ;;  %s1526_s4 = inlined_call_operand.hbm [shape: f32[2,8,32], index: 4, kind: output, shape index: {0}]   ;;  %s1527_s5 = inlined_call_operand.hbm [shape: f32[2,8,32], index: 5, kind: output, shape index: {1}]  }
   0x1   :  { %1534 = sst [smem:[#allocation23_spill]] %s1523_s1 }
   0x2   :  { %1535 = sst [smem:[#allocation24_spill]] %s1525_s3 }
   0x3   :  { %11 = vsyncpa [#allocation3], 0 }
   0x4   :  { %13 = vsyncpa [#allocation3 + $0x1], 0 }
   0x5   :  { %14 = vsyncpa [#allocation6], 0 }
   0x6   :  { %16 = vsyncpa [#allocation6 + $0x1], 0 }
   0x7   :  { %17 = vsyncpa [#allocation9], 0 }
   0x8   :  { %18 = vsyncpa [#allocation4], 0 }
   0x9   :  { %20 = vsyncpa [#allocation4 + $0x1], 0 }
   0xa   :  { %21 = vsyncpa [#allocation12], 0 }
   0xb   :  { %23 = vsyncpa [#allocation12 + $0x1], 0  ;;  %s1278_s18 = smov 0   ;;  %s1280_s19 = smov 0  }
   0xc   :  { %s1282_s20 = smov 0   ;;  %s1284_s21 = smov 0  }
   0xd   :  { %s1286_s22 = smov 0   ;;  %s1288_s23 = smov 0  }
   0xe LB: > { %1536 = sst [smem:[#allocation18_spill]] %s1235_s22  ;;  %s41_s24 = sadd.s32 1, %s1235_s22  ;;  %s1239_s23 = sphi %s1288_s23, %s29_s23   ;;  %s1235_s22 = sphi %s1286_s22, %s1553_s22   ;;  %s1231_s21 = sphi %s1284_s21, %s1552_s21   ;;  %s1227_s20 = sphi %s1282_s20, %s1556_s20   ;;  %s1223_s19 = sphi %s1280_s19, %s1555_s19   ;;  %s1219_s18 = sphi %s1278_s18, %s1554_s18  }
   0xf   : > { %1537 = sst [smem:[#allocation19_spill]] %s1239_s23  ;;  %s50_s25 = sadd.s32 1, %s1227_s20 }
  0x10   : > { %p43_p0 = scmp.ge.s32.totalorder %s41_s24, 2  ;;  %p57_p1 = scmp.ne.s32.totalorder %s1227_s20, %s1223_s19 }
  0x11   : > { %p58_p2 = scmp.eq.s32.totalorder %s1239_s23, 0  ;;  %p857_p3 = scmp.ge.s32.totalorder %s1239_s23, 2 }
  0x12   : > { %s1558_s24 = smov (%p43_p0, %s41_s24), 0  ;;  %p923_p5 = scmp.lt.s32.totalorder %s1239_s23, 2 }
  0x13   : > { %1538 = sst [smem:[#allocation20_spill]] %s1558_s24  ;;  %p59_p4 = por %p58_p2, %p57_p1 }
  0x14   : > { %s45_s26 = ssub.s32 %s1235_s22, %s1558_s24  ;;  %s1528_s27 = sand.u32 1, %s1227_s20  }
  0x15   : > { %p48_p6 = scmp.eq.s32.totalorder %s45_s26, 0  ;;  %s1325_s28 = sshll.u32 %s1528_s27, 3 }
  0x16   : > { %s1328_s29 = sshll.u32 %s1235_s22, 3  ;;  %p1330_p7 = pnand %p923_p5, %p59_p4 }
  0x17   : > { %s1335_s6 = scalar_select %p48_p6, %s1227_s20, %s50_s25  }
  0x18   : > { %s248_s7 = sand.u32 1, %s1239_s23   ;;  %s1541_s1 = sld [smem:[#allocation23_spill]] }
  0x19   : > { %1540 = sst [smem:[#allocation21_spill]] %s1335_s6  ;;  %s252_s11 = scalar_lea.vmem [#allocation5], %s1325_s28 }
  0x1a   : > { %s260_s12 = sshll.u32 %s252_s11, 4  ;;  %s1343_s14 = scalar_lea.sflag [#allocation6], %s248_s7  ;;  %s261_s12 = int_to_ptr.vmem [resolvable:$true] %s260_s12 }
  0x1b   : > { %s1349_s15 = sadd.s32 4294967295, %s1239_s23   ;;  %s854_s16 = sadd.s32 4294967294, %s1239_s23  }
  0x1c   : > { %p63_p8 = scmp.ne.s32.totalorder %s1223_s19, %s1219_s18  ;;  %p64_p9 = scmp.eq.s32.totalorder %s1349_s15, 0 }
  0x1d   : > { %p162_p10 = scmp.eq.s32.totalorder %s1349_s15, 1  ;;  %p168_p11 = scmp.eq.s32.totalorder %s854_s16, 1 }
  0x1e   : > { %s256_s10 = scalar_lea.hbm %s1541_s1, %s1328_s29  ;;  %p855_p12 = scmp.ge.s32.totalorder %s1239_s23, 1 }
  0x1f   : > { %s258_s13 = sshll.u32 %s256_s10, 4  ;;  %p1359_p13 = por %p64_p9, %p63_p8  ;;  %s259_s13 = int_to_ptr.hbm [resolvable:$true] %s258_s13 }
  0x20   : > { %911 = dma.hbm_to_vmem [thread:$0]  (!%p1330_p7), %s259_s13, 128, %s261_s12, %s1343_s14  }
  0x21   : > { %p1366_p0 = por %p162_p10, %p57_p1  ;;  %p1370_p2 = por %p168_p11, %p63_p8 }
  0x22   : > { %p203_p4 = scmp.lt.s32.totalorder %s1239_s23, 3  ;;  %s1546_s3 = sld [smem:[#allocation24_spill]] }
  0x23   : > { %s1544_s26 = scalar_select %p1370_p2, 1, 0 }
  0x24   : > { %p1378_p5 = pnand %p855_p12, %p203_p4  ;;  %s1241_s11 = smov [#allocation8]  }
  0x25   : > { %1545 = sst [smem:[#allocation22_spill]] %s1544_s26  ;;  %s217_s12 = sshll.u32 %s1241_s11, 4  ;;  %s218_s12 = int_to_ptr.vmem [resolvable:$true] %s217_s12 }
  0x26   : > { %p901_p1 = pneg %p1378_p5  ;;  %s237_s7 = scalar_lea.hbm %s1522_s0, %s1328_s29 }
  0x27   : > { %s239_s8 = sshll.u32 %s237_s7, 4  ;;  %s232_s27 = scalar_lea.vmem [#allocation2], %s1325_s28  ;;  %s240_s8 = int_to_ptr.hbm [resolvable:$true] %s239_s8 }
  0x28   : > { %s215_s9 = sshll.u32 %s1546_s3, 4  ;;  %p902_p6 = pnand %p901_p1, %p64_p9  ;;  %s216_s9 = int_to_ptr.hbm [resolvable:$true] %s215_s9 }
  0x29   : > { %s241_s1 = sshll.u32 %s232_s27, 4  ;;  %s1548_s3 = sand.u32 1, %s1227_s20   ;;  %s242_s1 = int_to_ptr.vmem [resolvable:$true] %s241_s1 }
  0x2a   : > { %904 = dma.hbm_to_vmem [thread:$0]  (!%p902_p6), %s216_s9, 128, %s218_s12, [#allocation9]  }
  0x2b   : > { %s229_s24 = scalar_lea.sflag [#allocation3], %s1548_s3  ;;  %s275_s6 = scalar_lea.hbm %s1524_s2, %s1328_s29 }
  0x2c   : > { %908 = dma.hbm_to_vmem [thread:$0]  (!%p1330_p7), %s240_s8, 128, %s242_s1, %s229_s24  }
  0x2d   : > { %s271_s23 = scalar_lea.vmem [#allocation7], %s1325_s28  ;;  %s277_s13 = sshll.u32 %s275_s6, 4  ;;  %s278_s13 = int_to_ptr.hbm [resolvable:$true] %s277_s13 }
  0x2e   : > { %s279_s26 = sshll.u32 %s271_s23, 4  ;;  %288 = sbr.rel (%p1378_p5) target bundleno = 841 (0x349), region = 36  ;;  %s280_s26 = int_to_ptr.vmem [resolvable:$true] %s279_s26 }
  0x2f   : > { %914 = dma.hbm_to_vmem [thread:$0]  (!%p1330_p7), %s278_s13, 128, %s280_s26, %s1343_s14  }
  0x30   : > { %s1406_s27 = sand.u32 (!%p1378_p5), 1, %s1223_s19  }
  0x31   : > { %s1409_s1 = sshll.u32 (!%p1378_p5), %s1406_s27, 3  ;;  %s291_s3 = scalar_lea.sflag (!%p1378_p5), [#allocation3], %s1406_s27 }
  0x32   : > { %s294_s22 = scalar_lea.vmem (!%p1378_p5), [#allocation2], %s1409_s1 }
  0x33   : > { %1198 = dma.done.wait (%p1359_p13), %s291_s3, 128  }
  0x34   : > { %1200 = vsyncadd (%p1359_p13), %s291_s3, 4294967168  ;;  %s300_s23 = sand.u32 1, %s1349_s15   ;;  %s304_s28 = scalar_lea.vmem [#allocation5], %s1409_s1 }
  0x35   : > { %s301_s24 = scalar_lea.sflag [#allocation6], %s300_s23 }
  0x36   : > { %1202 = dma.done.wait (%p1359_p13), %s301_s24, 256  }
  0x37   : > { %1204 = vsyncadd (%p1359_p13), %s301_s24, 4294967040  ;;  %s314_s29 = scalar_lea.vmem [#allocation7], %s1409_s1 }
  0x38   : > { %1206 = dma.done.wait (%p64_p9), [#allocation9], 128  }
  0x39   : > { %1208 = vsyncadd (%p64_p9), [#allocation9], 4294967168  ;;  %vm365_vm0 = vcmask 64512   ;;  %v363_v0 = vld [vmem:[%s304_s28] sm:$0xff]  ;;  %v362_v1 = vld [vmem:[%s294_s22] sm:$0xff]  ;;  %s1242_s30 = smov 112  }
  0x3a   : > { %481 = vrot.lane.b32.xlu0 %v363_v0, %s1242_s30  ;;  %871 = vmatpush.xpose.msk.msra.mxu0 %vm365_vm0, %v363_v0  ;;  %s1243_s6 = smov 104   ;;  %s1244_s14 = smov 120   ;;  %v364_v52 = vld [vmem:[%s314_s29] sm:$0xff] }
  0x3b   : > { %479 = vrot.lane.b32.xlu1 %v362_v1, %s1242_s30  ;;  %539 = vrot.lane.b32.xlu2 %v362_v1, %s1243_s6  ;;  %s1454_s15 = scalar_lea.vmem [#allocation11], %s1409_s1  ;;  %s1245_s17 = smov 16  }
  0x3c   : > { %s1246_s26 = smov 8   ;;  %s1247_s9 = smov 24  }
  0x3d   : > { %872 = vmatmul.msk.f32.vlgmr.msra.gmra.mxu0 %vm365_vm0, %v362_v1  ;;  %s883_s10 = sshll.u32 %s1231_s21, 3  ;;  %s683_s8 = sshll.u32 %s1454_s15, 4  ;;  %s684_s8 = int_to_ptr.vmem [resolvable:$true] %s683_s8 }
  0x3e   : > { %618 = vmatpush.msrb.mxu0 %v364_v52  ;;  %s681_s7 = scalar_lea.hbm %s1527_s5, %s883_s10  ;;  %s655_s13 = scalar_lea.sflag [#allocation12], %s1406_s27 }
  0x3f   : > { %s685_s11 = sshll.u32 %s681_s7, 4  ;;  %s1137_s24 = scalar_lea.hbm %s1527_s5, 16  ;;  %s686_s11 = int_to_ptr.hbm [resolvable:$true] %s685_s11 }
  0x40   : > { %s1131_s3 = sshra.s32 %s686_s11, 4  ;;  %s1132_s3 = int_to_ptr.hbm [resolvable:$true] %s1131_s3 }
  0x41   : > { %s1133_s22 = scalar_lea.hbm %s1132_s3, 8  ;;  %p1138_p10 = scmp.lt.s32.totalorder %s1132_s3, %s1527_s5 }
  0x42   : > { %541 = vrot.lane.b32.xlu0 %v363_v0, %s1243_s6  ;;  %p1134_p7 = scmp.ne.s32.totalorder %s1132_s3, %s1133_s22  ;;  %p1139_p11 = scmp.lt.s32.totalorder %s1137_s24, %s1133_s22 }
  0x43   : > { %421 = vrot.lane.b32.xlu1 %v363_v0, %s1244_s14  ;;  %419 = vrot.lane.b32.xlu2 %v362_v1, %s1244_s14 }
  0x44   : > { %p1135_p8 = pnand %p1134_p7, %p1366_p0  ;;  %p1140_p12 = por %p1139_p11, %p1138_p10 }
  0x46   : > { %p1136_p9 = pneg %p1135_p8 }
  0x48   : > { %p1141_p13 = pnand %p1140_p12, %p1136_p9 }
  0x95   : > { %v540_v3 = vpop.permute.xlu2 %539 }
  0x9d   : > { %v420_v7 = vpop.permute.xlu2 %419 }
  0xac   : > { %v482_v2 = vpop.permute.xlu0 %481 }
  0xad   : > { %v480_v4 = vpop.permute.xlu1 %479  ;;  %875 = vmatpush.xpose.msk.msra.mxu2 %vm365_vm0, %v482_v2 }
  0xb0   : > { %876 = vmatmul.msk.f32.vlgmr.msra.gmra.mxu2 %vm365_vm0, %v480_v4 }
  0xb4   : > { %v542_v5 = vpop.permute.xlu0 %541 }
  0xb5   : > { %v422_v6 = vpop.permute.xlu1 %421  ;;  %877 = vmatpush.xpose.msk.msra.mxu3 %vm365_vm0, %v542_v5 }
  0xb6   : > { %873 = vmatpush.xpose.msk.msra.mxu1 %vm365_vm0, %v422_v6 }
  0xb8   : > { %878 = vmatmul.msk.f32.vlgmr.msra.gmra.mxu3 %vm365_vm0, %v540_v3 }
  0xb9   : > { %874 = vmatmul.msk.f32.vlgmr.msra.gmra.mxu1 %vm365_vm0, %v420_v7 }
  0xba   : > { %v389_v8 = vpop.f32.mrf.mxu0 }
  0xbb   : > { %v392_v9 = vmul.f32 0.35355338, %v389_v8 }
  0xbd   : > { %v393_v10 = vsel %vm365_vm0, %v392_v9, -inf }
  0xbe   : > { %394 = vmax.xlane.f32.xlu0 %v393_v10 }
 0x131   : > { %v395_v11 = vpop.xlane.xlu0 %394 }
 0x132   : > { %v396_v12 = vsub.f32 %v392_v9, %v395_v11 }
 0x133   : > { %v504_v13 = vpop.f32.mrf.mxu2 }
 0x134   : > { %v397_v14 = vmul.f32 1.442695, %v396_v12  ;;  %v507_v15 = vmul.f32 0.35355338, %v504_v13 }
 0x136   : > { %981 = vpow2.f32 %v397_v14  ;;  %v444_v16 = vpop.f32.mrf.mxu1  ;;  %v508_v17 = vsel %vm365_vm0, %v507_v15, -inf }
 0x137   : > { %v447_v18 = vmul.f32 0.35355338, %v444_v16  ;;  %509 = vmax.xlane.f32.xlu2 %v508_v17 }
 0x139   : > { %v448_v19 = vsel %vm365_vm0, %v447_v18, -inf }
 0x13a   : > { %449 = vmax.xlane.f32.xlu1 %v448_v19 }
 0x13b   : > { %v564_v20 = vpop.f32.mrf.mxu3 }
 0x13c   : > { %v982_v21 = vpop.eup %981  ;;  %v567_v22 = vmul.f32 0.35355338, %v564_v20 }
 0x13d   : > { %v399_v23 = vsel %vm365_vm0, %v982_v21, 0.0 }
 0x13e   : > { %400 = vadd.xlane.f32.xlu0 %v399_v23  ;;  %v568_v24 = vsel %vm365_vm0, %v567_v22, -inf }
 0x13f   : > { %569 = vmax.xlane.f32.xlu2 %v568_v24 }
 0x1aa   : > { %v510_v25 = vpop.xlane.xlu2 %509 }
 0x1ab   : > { %v511_v26 = vsub.f32 %v507_v15, %v510_v25 }
 0x1ad   : > { %v512_v27 = vmul.f32 1.442695, %v511_v26  ;;  %v450_v28 = vpop.xlane.xlu1 %449 }
 0x1ae   : > { %v451_v29 = vsub.f32 %v447_v18, %v450_v28 }
 0x1af   : > { %983 = vpow2.f32 %v512_v27 }
 0x1b0   : > { %v452_v30 = vmul.f32 1.442695, %v451_v29  ;;  %v623_v29 = vld [vmem:[#allocation8] sm:$0xff] }
 0x1b1   : > { %v401_v31 = vpop.xlane.xlu0 %400  ;;  %642 = vmatpush.msrb.mxu1 %v623_v29 }
 0x1b2   : > { %985 = vpow2.f32 %v452_v30  ;;  %v570_v32 = vpop.xlane.xlu2 %569  ;;  %v413_v43 = vand.u32 2147483648, %v401_v31  ;;  %v411_v45 = vand.u32 2147483647, %v401_v31  ;;  %vm407_vm2 = vweird.f32 %v401_v31 }
 0x1b3   : > { %987 = vrcp.f32 %v401_v31  ;;  %v571_v33 = vsub.f32 %v567_v22, %v570_v32 }
 0x1b4   : > { %v414_v48 = vor.u32 1.1754944e-38, %v413_v43  ;;  %vm412_vm4 = vcmp.eq.f32.partialorder %v411_v45, 8.507059e+37 }
 0x1b5   : > { %v1441_v34 = vpop.eup %983  ;;  %v572_v35 = vmul.f32 1.442695, %v571_v33 }
 0x1b6   : > { %v514_v36 = vsel %vm365_vm0, %v1441_v34, 0.0 }
 0x1b7   : > { %989 = vpow2.f32 %v572_v35  ;;  %515 = vadd.xlane.f32.xlu2 %v514_v36 }
 0x1b8   : > { %v1445_v37 = vpop.eup %985 }
 0x1b9   : > { %v988_v38 = vpop.eup %987  ;;  %v454_v39 = vsel %vm365_vm0, %v1445_v37, 0.0 }
 0x1ba   : > { %v403_v40 = vmul.f32 %v988_v38, %v401_v31  ;;  %455 = vadd.xlane.f32.xlu1 %v454_v39  ;;  %vm408_vm1 = vweird.f32 %v988_v38 }
 0x1bb   : > { %vm409_vm3 = vmor %vm407_vm2, %vm408_vm1  ;;  %vm476_vm2 = vcmask 130112  }
 0x1bc   : > { %v404_v41 = vsub.f32 1.0, %v403_v40 }
 0x1bd   : > { %v1449_v42 = vpop.eup %989 }
 0x1be   : > { %v405_v44 = vmul.f32 %v988_v38, %v404_v41  ;;  %v574_v46 = vsel %vm365_vm0, %v1449_v42, 0.0 }
 0x1bf   : > { %575 = vadd.xlane.f32.xlu0 %v574_v46 }
 0x1c0   : > { %v406_v47 = vadd.f32 %v988_v38, %v405_v44 }
 0x1c2   : > { %v410_v49 = vsel %vm409_vm3, %v988_v38, %v406_v47  ;;  %vm536_vm3 = vcmask 195712  }
 0x1c3   : > { %v415_v50 = vsel %vm412_vm4, %v414_v48, %v410_v49  ;;  %vm596_vm4 = vcmask 261312  }
 0x1c4   : > { %v416_v51 = vmul.f32 %v982_v21, %v415_v50 }
 0x1c6   : > { %417 = vst.msk [vmem:[%s1454_s15] sm:$0xff] %vm365_vm0, %v416_v51 }
 0x22a   : > { %v516_v53 = vpop.xlane.xlu2 %515 }
 0x22b   : > { %991 = vrcp.f32 %v516_v53  ;;  %v528_v60 = vand.u32 2147483648, %v516_v53  ;;  %v526_v63 = vand.u32 2147483647, %v516_v53  ;;  %vm522_vm6 = vweird.f32 %v516_v53 }
 0x22d   : > { %v456_v54 = vpop.xlane.xlu1 %455  ;;  %v529_v4 = vor.u32 1.1754944e-38, %v528_v60  ;;  %vm527_vm9 = vcmp.eq.f32.partialorder %v526_v63, 8.507059e+37 }
 0x22e   : > { %993 = vrcp.f32 %v456_v54  ;;  %v468_v1 = vand.u32 2147483648, %v456_v54  ;;  %v466_v6 = vand.u32 2147483647, %v456_v54  ;;  %vm462_vm10 = vweird.f32 %v456_v54 }
 0x230   : > { %v469_v11 = vor.u32 1.1754944e-38, %v468_v1  ;;  %vm467_vm12 = vcmp.eq.f32.partialorder %v466_v6, 8.507059e+37 }
 0x231   : > { %v992_v55 = vpop.eup %991 }
 0x232   : > { %v518_v56 = vmul.f32 %v992_v55, %v516_v53  ;;  %v576_v57 = vpop.xlane.xlu0 %575  ;;  %vm523_vm5 = vweird.f32 %v992_v55 }
 0x233   : > { %995 = vrcp.f32 %v576_v57  ;;  %vm524_vm7 = vmor %vm522_vm6, %vm523_vm5  ;;  %v588_v14 = vand.u32 2147483648, %v576_v57  ;;  %v586_v18 = vand.u32 2147483647, %v576_v57  ;;  %vm582_vm14 = vweird.f32 %v576_v57 }
 0x234   : > { %v994_v58 = vpop.eup %993  ;;  %v519_v59 = vsub.f32 1.0, %v518_v56 }
 0x235   : > { %v458_v61 = vmul.f32 %v994_v58, %v456_v54  ;;  %vm463_vm8 = vweird.f32 %v994_v58  ;;  %v589_v21 = vor.u32 1.1754944e-38, %v588_v14  ;;  %vm587_vm1 = vcmp.eq.f32.partialorder %v586_v18, 8.507059e+37 }
 0x236   : > { %v520_v62 = vmul.f32 %v992_v55, %v519_v59  ;;  %vm464_vm11 = vmor %vm462_vm10, %vm463_vm8 }
 0x237   : > { %v459_v0 = vsub.f32 1.0, %v458_v61 }
 0x238   : > { %v521_v2 = vadd.f32 %v992_v55, %v520_v62 }
 0x239   : > { %v996_v3 = vpop.eup %995  ;;  %v460_v5 = vmul.f32 %v994_v58, %v459_v0 }
 0x23a   : > { %v578_v7 = vmul.f32 %v996_v3, %v576_v57  ;;  %v525_v8 = vsel %vm524_vm7, %v992_v55, %v521_v2  ;;  %vm583_vm13 = vweird.f32 %v996_v3 }
 0x23b   : > { %v530_v9 = vsel %vm527_vm9, %v529_v4, %v525_v8  ;;  %v461_v10 = vadd.f32 %v994_v58, %v460_v5  ;;  %vm584_vm15 = vmor %vm582_vm14, %vm583_vm13 }
 0x23c   : > { %v579_v12 = vsub.f32 1.0, %v578_v7  ;;  %v531_v13 = vmul.f32 %v1441_v34, %v530_v9 }
 0x23d   : > { %v465_v15 = vsel %vm464_vm11, %v994_v58, %v461_v10 }
 0x23e   : > { %v580_v16 = vmul.f32 %v996_v3, %v579_v12  ;;  %533 = vrot.lane.b32.xlu2 %v531_v13, %s1245_s17  ;;  %v470_v17 = vsel %vm467_vm12, %v469_v11, %v465_v15 }
 0x23f   : > { %v471_v19 = vmul.f32 %v1445_v37, %v470_v17 }
 0x240   : > { %v581_v20 = vadd.f32 %v996_v3, %v580_v16 }
 0x241   : > { %473 = vrot.lane.b32.xlu1 %v471_v19, %s1246_s26  ;;  %v478_v22 = vadd.f32 %v471_v19, %v416_v51 }
 0x242   : > { %v585_v23 = vsel %vm584_vm15, %v996_v3, %v581_v20 }
 0x243   : > { %v590_v24 = vsel %vm587_vm1, %v589_v21, %v585_v23  ;;  %v538_v25 = vadd.f32 %v531_v13, %v478_v22 }
 0x244   : > { %v591_v26 = vmul.f32 %v1449_v42, %v590_v24 }
 0x246   : > { %593 = vrot.lane.b32.xlu0 %v591_v26, %s1247_s9  ;;  %v598_v27 = vadd.f32 %v591_v26, %v538_v25 }
 0x248   : > { %v599_v28 = vmul.f32 0.25, %v598_v27 }
 0x24a   : > { %879 = vmatmul.msk.f32.vlgmr.msrb.gmra.mxu0 %vm365_vm0, %v599_v28 }
 0x298   : > { %v534_v31 = vpop.permute.xlu2 %533 }
 0x2b3   : > { %v474_v30 = vpop.permute.xlu1 %473 }
 0x2b4   : > { %477 = vst.msk [vmem:[%s1454_s15] sm:$0xff] %vm476_vm2, %v474_v30 }
 0x2b5   : > { %537 = vst.msk [vmem:[%s1454_s15] sm:$0xff] %vm536_vm3, %v534_v31 }
 0x2b8   : > { %v594_v32 = vpop.permute.xlu0 %593 }
 0x2b9   : > { %597 = vst.msk [vmem:[%s1454_s15] sm:$0xff] %vm596_vm4, %v594_v32 }
 0x2c7   : > { %v620_v33 = vpop.f32.mrf.mxu0 }
 0x2c8   : > { %880 = vmatmul.msk.f32.vlgmr.msrb.gmra.mxu1 %vm365_vm0, %v620_v33 }
 0x2c9   : > { %1144 = shalt.err (!%p1141_p13)
}
 0x2ca   : > { %898 = dma.vmem_to_hbm [thread:$0]  (%p1366_p0), %s684_s8, 128, %s686_s11, %s655_s13   ;;  %vm647_vm0 = vcmask 261120  }
 0x2cb   : > { %s666_s14 = scalar_lea.hbm %s1526_s4, %s883_s10  ;;  %s354_s15 = scalar_lea.vmem [#allocation10], %s1409_s1 }
 0x2cc   : > { %s668_s17 = sshll.u32 %s354_s15, 4  ;;  %s670_s26 = sshll.u32 %s666_s14, 4  ;;  %s669_s17 = int_to_ptr.vmem [resolvable:$true] %s668_s17  ;;  %s671_s26 = int_to_ptr.hbm [resolvable:$true] %s670_s26 }
 0x2cd   : > { %s650_s9 = scalar_lea.sflag [#allocation4], %s1406_s27  ;;  %s1159_s12 = sshra.s32 %s671_s26, 4  ;;  %s1160_s12 = int_to_ptr.hbm [resolvable:$true] %s1159_s12 }
 0x2ce   : > { %s1161_s16 = scalar_lea.hbm %s1160_s12, 8  ;;  %s1165_s10 = scalar_lea.hbm %s1526_s4, 16 }
 0x2cf   : > { %p1162_p4 = scmp.ne.s32.totalorder %s1160_s12, %s1161_s16  ;;  %p1166_p6 = scmp.lt.s32.totalorder %s1160_s12, %s1526_s4 }
 0x2d0   : > { %p1167_p7 = scmp.lt.s32.totalorder %s1165_s10, %s1161_s16 }
 0x2d1   : > { %p1163_p5 = pnand %p1162_p4, %p1366_p0 }
 0x2d2   : > { %p1168_p8 = por %p1167_p7, %p1166_p6 }
 0x2d3   : > { %p1164_p1 = pneg %p1163_p5 }
 0x2d5   : > { %p1169_p9 = pnand %p1168_p8, %p1164_p1 }
 0x345   : > { %v644_v34 = vpop.f32.mrf.mxu1 }
 0x346   : > { %648 = vst.msk [vmem:[%s354_s15] sm:$0xff] %vm647_vm0, %v644_v34 }
 0x347   : > { %1172 = shalt.err (!%p1169_p9)
}
 0x348   : > { %897 = dma.vmem_to_hbm [thread:$0]  (%p1366_p0), %s669_s17, 128, %s671_s26, %s650_s9  }
 0x349 PF: > { %s1550_s13 = sld [smem:[#allocation19_spill]]  ;;  %s697_s3 = sand.u32 1, %s1219_s18  }
 0x34a   : > { %p916_p10 = pnand %p857_p3, %p1370_p2  ;;  %s698_s22 = scalar_lea.sflag [#allocation4], %s697_s3 }
 0x34c   : > { %p917_p11 = pneg %p916_p10 }
 0x34e   : > { %1210 = dma.done.wait (%p917_p11), %s698_s22, 128  }
 0x34f   : > { %1212 = vsyncadd (%p917_p11), %s698_s22, 4294967168  ;;  %s708_s21 = scalar_lea.sflag [#allocation12], %s697_s3 }
 0x350   : > { %1214 = dma.done.wait (%p917_p11), %s708_s21, 128  }
 0x351   : > { %1216 = vsyncadd (%p917_p11), %s708_s21, 4294967168  ;;  %s29_s23 = sadd.s32 1, %s1550_s13   ;;  %s1551_s25 = sld [smem:[#allocation21_spill]] }
 0x352   : > { %p26_p12 = scmp.ge.s32.totalorder %s29_s23, 4   ;;  %s1552_s21 = sld [smem:[#allocation18_spill]] }
 0x353   : > { %s1553_s22 = sld [smem:[#allocation20_spill]]  ;;  %s1554_s18 = smov %s1223_s19 }
 0x354   : > { %s1555_s19 = smov %s1227_s20  ;;  %28 = sbr.rel (!%p26_p12) target bundleno = 14 (0xe), region = 126 }
 0x357   : > { %s1556_s20 = smov %s1551_s25 }
 0x359   :  { %714 = vsyncpa [#allocation3], 1 }
 0x35a   :  { %716 = vsyncpa [#allocation3 + $0x1], 1 }
 0x35b   :  { %717 = vsyncpa [#allocation6], 1 }
 0x35c   :  { %719 = vsyncpa [#allocation6 + $0x1], 1 }
 0x35d   :  { %720 = vsyncpa [#allocation9], 1 }
 0x35e   :  { %721 = vsyncpa [#allocation4], 1 }
 0x35f   :  { %723 = vsyncpa [#allocation4 + $0x1], 1 }
 0x360   :  { %724 = vsyncpa [#allocation12], 1 }
 0x361   :  { %726 = vsyncpa [#allocation12 + $0x1], 1 }

</bundles_post_ra>
